<compile_context>
chip_gen: v6e
topology: v6e:2x2x1
jax: 0.10.0
libtpu: 0.0.40
codegen_flags: <defaults>
</compile_context>

<pallas_src>
import functools

import jax
import jax.numpy as jnp
from jax import lax
from jax.experimental import pallas as pl
from jax.experimental.pallas import tpu as pltpu

LANES = 128
SUBLANES = 8
MAX_BLOCK_ROWS = 8192          # 8192 x 128 f32 = 4 MiB per input tile
ACC_ROWS_TARGET = 64           # (64, 128) f32 partial accumulator (8 vregs)
SMALL_INPUT_BYTES = 1 << 20    # below this, fused XLA beats a kernel launch
VMEM_LIMIT_BYTES = 32 * 1024 * 1024


def _round_up(x: int, m: int) -> int:
    return (x + m - 1) // m * m


def _round_down(x: int, m: int) -> int:
    return x // m * m


@functools.lru_cache(maxsize=None)
def _num_tensorcores() -> int:
    """2 on v7x (two TensorCores per chip), else 1 (v5e / v6e)."""
    try:
        kind = jax.devices()[0].device_kind.lower()
    except Exception:  # pragma: no cover - defensive
        return 1
    return 2 if "v7" in kind else 1


def _mse_partial_kernel(x_ref, y_ref, o_ref, *, rows, block_rows, acc_rows,
                        num_blocks, blocks_per_core, split_cores, needs_mask):
    """Accumulate per-(sublane, lane) partial sums of squared differences."""
    if split_cores:
        c = pl.program_id(0)   # core axis (CORE_PARALLEL on v7x)
        j = pl.program_id(1)   # reduction axis
    else:
        c = 0
        j = pl.program_id(0)   # reduction axis (only axis)
    blk = c * blocks_per_core + j

    @pl.when(j == 0)
    def _():
        o_ref[...] = jnp.zeros_like(o_ref)

    def accumulate(masked: bool):
        d = x_ref[...].astype(jnp.float32) - y_ref[...].astype(jnp.float32)
        if masked:
            # Zero rows past the end of the slab: ragged tail of the last real
            # block and (on the split path) the fully-phantom clamped block.
            row0 = blk * block_rows
            row_ids = row0 + lax.broadcasted_iota(jnp.int32, (block_rows, LANES), 0)
            d = jnp.where(row_ids < rows, d, 0.0)
        sq = d * d
        # Fold (block_rows, 128) -> (acc_rows, 128) with pure vector adds; the
        # widened target keeps several independent add chains per step.
        if acc_rows == block_rows:
            partial = sq
        elif acc_rows == 1:
            partial = jnp.sum(sq, axis=0, keepdims=True)
        else:
            partial = sq.reshape(block_rows // acc_rows, acc_rows, LANES).sum(axis=0)
        o_ref[...] += partial[None, :, :]

    if needs_mask:
        # Only the last real block (and phantom blocks) pay for the mask.
        @pl.when(blk >= num_blocks - 1)
        def _():
            accumulate(True)

        @pl.when(blk < num_blocks - 1)
        def _():
            accumulate(False)
    else:
        accumulate(False)


def _mse_sumsq_pallas(x2, y2, max_block_rows: int):
    """Sum of squared differences over a lane-dense (rows, 128) slab (f32)."""
    rows = x2.shape[0]
    itemsize_min = min(jnp.dtype(x2.dtype).itemsize, jnp.dtype(y2.dtype).itemsize)
    row_align = SUBLANES * max(1, 4 // itemsize_min)   # 8 (f32) / 16 (bf16) / 32 (i8)

    # ---- block sizing (block_rows never exceeds rows) ----------------------
    if rows <= max_block_rows:
        block_rows = rows                               # single full-dim block
    else:
        align = max(row_align, ACC_ROWS_TARGET) if max_block_rows >= ACC_ROWS_TARGET else row_align
        block_rows = max(_round_down(min(max_block_rows, rows), align), row_align)
        if block_rows >= rows:
            block_rows = rows
    num_blocks = pl.cdiv(rows, block_rows)

    # ---- optional core split (v7x only) ------------------------------------
    split_cores = (_num_tensorcores() == 2) and (num_blocks >= 2)
    if split_cores and num_blocks % 2 == 1:
        # Try to rebalance to an even block count instead of a phantom block.
        br2 = _round_up(pl.cdiv(rows, num_blocks + 1), ACC_ROWS_TARGET)
        if (row_align <= br2 < rows and br2 % row_align == 0
                and pl.cdiv(rows, br2) % 2 == 0):
            block_rows = br2
            num_blocks = pl.cdiv(rows, br2)
    ncores = 2 if split_cores else 1
    blocks_per_core = pl.cdiv(num_blocks, ncores)

    needs_mask = (rows % block_rows != 0) or (blocks_per_core * ncores != num_blocks)

    # Widened accumulator: largest power-of-two divisor of block_rows, <= 64.
    acc_rows = ACC_ROWS_TARGET
    while acc_rows > 1 and block_rows % acc_rows:
        acc_rows //= 2

    kernel = functools.partial(
        _mse_partial_kernel,
        rows=rows, block_rows=block_rows, acc_rows=acc_rows,
        num_blocks=num_blocks, blocks_per_core=blocks_per_core,
        split_cores=split_cores, needs_mask=needs_mask,
    )

    if split_cores:
        grid = (ncores, blocks_per_core)

        def in_map(c, j):
            # Clamp a phantom block (odd block count) to a valid block; its
            # contribution is zeroed by the in-kernel row mask.
            return (jnp.minimum(c * blocks_per_core + j, num_blocks - 1), 0)

        out_spec = pl.BlockSpec((1, acc_rows, LANES), lambda c, j: (c, 0, 0))
        dim_sem = (pltpu.CORE_PARALLEL, "arbitrary")
    else:
        grid = (num_blocks,)

        def in_map(j):
            return (j, 0)

        out_spec = pl.BlockSpec((1, acc_rows, LANES), lambda j: (0, 0, 0))
        dim_sem = ("arbitrary",)

    partials = pl.pallas_call(
        kernel,
        out_shape=jax.ShapeDtypeStruct((ncores, acc_rows, LANES), jnp.float32),
        grid_spec=pltpu.PrefetchScalarGridSpec(
            num_scalar_prefetch=0,
            grid=grid,
            in_specs=[
                pl.BlockSpec((block_rows, LANES), in_map),
                pl.BlockSpec((block_rows, LANES), in_map),
            ],
            out_specs=out_spec,
        ),
        compiler_params=pltpu.CompilerParams(
            dimension_semantics=dim_sem,
            vmem_limit_bytes=VMEM_LIMIT_BYTES,
        ),
    )(x2, y2)

    # Final cross-lane reduce of the tiny (ncores, acc_rows, 128) slab.
    return jnp.sum(partials)


def _content_loss_pallas(x: jax.Array, y: jax.Array, *,
                         max_block_rows: int = MAX_BLOCK_ROWS) -> jax.Array:
    """MSE ('mean') via the Pallas kernel (no small-input fast path)."""
    assert x.shape == y.shape, "mse_loss requires matching shapes"
    n_elems = x.size
    out_dtype = jnp.result_type(x.dtype, y.dtype)

    xf = x.reshape(-1)
    yf = y.reshape(-1)
    n_main = (n_elems // LANES) * LANES

    if n_main == 0:
        d = xf.astype(jnp.float32) - yf.astype(jnp.float32)
        return (jnp.sum(d * d) / jnp.float32(n_elems)).astype(out_dtype)

    if n_main == n_elems:
        x2 = xf.reshape(-1, LANES)
        y2 = yf.reshape(-1, LANES)
        tail_ssq = jnp.float32(0.0)
    else:
        # Lane-aligned prefix goes through the kernel; the (<128-element) tail
        # is summed with plain JAX.  No jnp.pad: padding would materialize a
        # full HBM copy of both inputs before a kernel that only reads them.
        x2 = xf[:n_main].reshape(-1, LANES)
        y2 = yf[:n_main].reshape(-1, LANES)
        dt = xf[n_main:].astype(jnp.float32) - yf[n_main:].astype(jnp.float32)
        tail_ssq = jnp.sum(dt * dt)

    main_ssq = _mse_sumsq_pallas(x2, y2, max_block_rows)
    loss = (main_ssq + tail_ssq) / jnp.float32(n_elems)
    return loss.astype(out_dtype)


def content_loss(x: jax.Array, y: jax.Array) -> jax.Array:
    """Equivalent of torch.nn.functional.mse_loss(x, y) ('mean' reduction)."""
    assert x.shape == y.shape, "mse_loss requires matching shapes"
    # Small-input fast path: pallas_call launch + the separate wrapper reduce
    # dominate tiny inputs; let XLA fuse subtract/square/mean directly.
    if x.size * jnp.dtype(x.dtype).itemsize < SMALL_INPUT_BYTES:
        d = x.astype(jnp.float32) - y.astype(jnp.float32)
        return jnp.mean(d * d).astype(jnp.result_type(x.dtype, y.dtype))
    return _content_loss_pallas(x, y)


if __name__ == "__main__":
    key = jax.random.PRNGKey(0)
    k1, k2, k3, k4 = jax.random.split(key, 4)

    # NCHW conv-feature layout consistent with the module: batch=2, channels=4, 16x16.
    x = jax.random.normal(k1, (2, 4, 16, 16), dtype=jnp.float32)
    y = jax.random.normal(k2, (2, 4, 16, 16), dtype=jnp.float32)
    ref = jnp.mean((x - y) ** 2)

    # 1) Public entry point (small input -> fused-XLA fast path).
    out_fast = content_loss(x, y)
    jax.block_until_ready(out_fast)
    assert jnp.allclose(out_fast, ref, rtol=1e-5, atol=1e-6), (out_fast, ref)

    # 2) Pallas kernel, single-block path (block_rows == rows).
    out_k1 = _content_loss_pallas(x, y)
    jax.block_until_ready(out_k1)
    assert jnp.allclose(out_k1, ref, rtol=1e-5, atol=1e-6), (out_k1, ref)

    # 3) Pallas kernel, multi-block accumulation path (small tile forces grid > 1).
    out_k2 = _content_loss_pallas(x, y, max_block_rows=8)
    jax.block_until_ready(out_k2)
    assert jnp.allclose(out_k2, ref, rtol=1e-5, atol=1e-6), (out_k2, ref)

    # 4) Ragged element count: exercises lane-aligned prefix + wrapper tail and
    #    the pl.when-gated last-block mask.
    xr = jax.random.normal(k3, (5, 3, 7, 13), dtype=jnp.float32)
    yr = jax.random.normal(k4, (5, 3, 7, 13), dtype=jnp.float32)
    ref_r = jnp.mean((xr - yr) ** 2)
    out_r = _content_loss_pallas(xr, yr, max_block_rows=8)
    jax.block_until_ready(out_r)
    assert jnp.allclose(out_r, ref_r, rtol=1e-5, atol=1e-6), (out_r, ref_r)

    # 5) bf16 inputs (f32 accumulation in-kernel, cast at the end).
    xb = x.astype(jnp.bfloat16)
    yb = y.astype(jnp.bfloat16)
    ref_b = jnp.mean((xb.astype(jnp.float32) - yb.astype(jnp.float32)) ** 2)
    out_b = _content_loss_pallas(xb, yb)
    jax.block_until_ready(out_b)
    assert jnp.allclose(out_b.astype(jnp.float32), ref_b, rtol=2e-2, atol=2e-2), (out_b, ref_b)

    print("KERNEL_OK")
</pallas_src>

<mosaic_0001>
module attributes {stable_mosaic.version = 11 : i64} {
  func.func @_mse_partial_kernel(%arg0: i32, %arg1: memref<16x128xf32, #tpu.memory_space<vmem>>, %arg2: memref<16x128xf32, #tpu.memory_space<vmem>>, %arg3: memref<1x16x128xf32, #tpu.memory_space<vmem>>) attributes {dimension_semantics = [#tpu.dimension_semantics<arbitrary>], iteration_bounds = array<i64: 1>, scalar_prefetch = 0 : i64, scratch_operands = 0 : i64, tpu.core_type = #tpu.core_type<tc>, window_params = [{transform_indices = @transform_0, window_bounds = array<i64: 16, 128>}, {transform_indices = @transform_1, window_bounds = array<i64: 16, 128>}, {pipeline_mode = #tpu.pipeline_mode<synchronous>, transform_indices = @transform_2, window_bounds = array<i64: 1, 16, 128>}]} {
    %c0_i32 = arith.constant 0 : i32
    %0 = arith.cmpi eq, %arg0, %c0_i32 : i32
    %1 = arith.extui %0 : i1 to i32
    %c0_i32_0 = arith.constant 0 : i32
    %2 = arith.cmpi ne, %1, %c0_i32_0 : i32
    scf.if %2 {
      %cst = arith.constant 0.000000e+00 : f32
      %11 = vector.broadcast %cst : f32 to vector<1x16x128xf32>
      %c0_10 = arith.constant 0 : index
      %c0_11 = arith.constant 0 : index
      %c0_12 = arith.constant 0 : index
      %12 = vector.load %arg3[%c0_10, %c0_11, %c0_12] : memref<1x16x128xf32, #tpu.memory_space<vmem>>, vector<1x16x128xf32>
      tpu.vector_store %arg3[%c0_10, %c0_11, %c0_12], %11 {strides = array<i32>} : memref<1x16x128xf32, #tpu.memory_space<vmem>>, vector<1x16x128xf32>,
    } else {
    }
    %c0 = arith.constant 0 : index
    %c0_1 = arith.constant 0 : index
    %3 = vector.load %arg1[%c0, %c0_1] : memref<16x128xf32, #tpu.memory_space<vmem>>, vector<16x128xf32>
    %c0_2 = arith.constant 0 : index
    %c0_3 = arith.constant 0 : index
    %4 = vector.load %arg2[%c0_2, %c0_3] : memref<16x128xf32, #tpu.memory_space<vmem>>, vector<16x128xf32>
    %5 = arith.subf %3, %4 : vector<16x128xf32>
    %6 = arith.mulf %5, %5 : vector<16x128xf32>
    %c0_4 = arith.constant 0 : index
    %c0_5 = arith.constant 0 : index
    %c0_6 = arith.constant 0 : index
    %7 = vector.load %arg3[%c0_4, %c0_5, %c0_6] : memref<1x16x128xf32, #tpu.memory_space<vmem>>, vector<1x16x128xf32>
    %8 = vector.shape_cast %6 : vector<16x128xf32> to vector<1x16x128xf32>
    %9 = arith.addf %7, %8 : vector<1x16x128xf32>
    %c0_7 = arith.constant 0 : index
    %c0_8 = arith.constant 0 : index
    %c0_9 = arith.constant 0 : index
    %10 = vector.load %arg3[%c0_7, %c0_8, %c0_9] : memref<1x16x128xf32, #tpu.memory_space<vmem>>, vector<1x16x128xf32>
    tpu.vector_store %arg3[%c0_7, %c0_8, %c0_9], %9 {strides = array<i32>} : memref<1x16x128xf32, #tpu.memory_space<vmem>>, vector<1x16x128xf32>,
    return
  }
  func.func @transform_0(%arg0: i32) -> (i32, i32) {
    %c0_i32 = arith.constant 0 : i32
    %c0_i32_0 = arith.constant 0 : i32
    return %arg0, %c0_i32 : i32, i32
  }
  func.func @transform_1(%arg0: i32) -> (i32, i32) {
    %c0_i32 = arith.constant 0 : i32
    %c0_i32_0 = arith.constant 0 : i32
    return %arg0, %c0_i32 : i32, i32
  }
  func.func @transform_2(%arg0: i32) -> (i32, i32, i32) {
    %c0_i32 = arith.constant 0 : i32
    %c0_i32_0 = arith.constant 0 : i32
    %c0_i32_1 = arith.constant 0 : i32
    %c0_i32_2 = arith.constant 0 : i32
    return %c0_i32, %c0_i32_0, %c0_i32_1 : i32, i32, i32
  }
}

</mosaic_0001>

<bundles_post_ra>
// kernel: tpu_custom_call.1
= control target key start
LH: loop header
LB: loop body
LE: loop exit
PB: predicated region body
PF: predicated region fallthrough
CT: control target
= control target key end

     0   :  { %7 = vsyncpa [#allocation3], 0  ;;  %s188_s0 = inlined_call_operand.hbm [shape: f32[16,128], index: 0, kind: input, shape index: {}]   ;;  %s189_s1 = inlined_call_operand.hbm [shape: f32[16,128], index: 1, kind: input, shape index: {}]   ;;  %s190_s2 = inlined_call_operand.hbm [shape: f32[1,16,128], index: 2, kind: output, shape index: {}]  }
   0x1   :  { %8 = vsyncpa [#allocation6], 0 }
   0x2   :  { %9 = vsyncpa [#allocation4], 0  ;;  %s150_s9 = smov [#allocation2]  }
   0x3   :  { %s15_s10 = sshll.u32 %s150_s9, 4  ;;  %s16_s10 = int_to_ptr.vmem [resolvable:$true] %s15_s10 }
   0x4   :  { %s92_s11 = scalar_lea.vmem %s16_s10, 256  ;;  %p97_p1 = scmp.lt.s32.totalorder %s16_s10, %s16_s10 }
   0x5   :  { %p93_p0 = scmp.ne.s32.totalorder %s16_s10, %s92_s11  ;;  %p98_p2 = scmp.lt.s32.totalorder %s92_s11, %s92_s11 }
   0x7   :  { %p99_p3 = por %p98_p2, %p97_p1 }
   0x9   :  { %p100_p4 = pnand %p99_p3, %p93_p0 }
   0xb   :  { %103 = shalt.err (!%p100_p4)
}
   0xc   :  { %s151_s12 = smov 128   ;;  %s152_s13 = smov 8  }
   0xd   :  { %21 = dma.hbm_to_vmem [thread:$0]  %s188_s0, 256, %s16_s10, [#allocation3], %s151_s12, %s151_s12, %s152_s13  }
   0xe   :  { %s153_s16 = smov [#allocation5]  }
   0xf   :  { %s27_s17 = sshll.u32 %s153_s16, 4  ;;  %s28_s17 = int_to_ptr.vmem [resolvable:$true] %s27_s17 }
  0x10   :  { %s112_s18 = scalar_lea.vmem %s28_s17, 256  ;;  %p117_p6 = scmp.lt.s32.totalorder %s28_s17, %s28_s17 }
  0x11   :  { %p113_p5 = scmp.ne.s32.totalorder %s28_s17, %s112_s18  ;;  %p118_p7 = scmp.lt.s32.totalorder %s112_s18, %s112_s18 }
  0x13   :  { %p119_p8 = por %p118_p7, %p117_p6 }
  0x15   :  { %p120_p9 = pnand %p119_p8, %p113_p5 }
  0x17   :  { %123 = shalt.err (!%p120_p9)
}
  0x18   :  { %33 = dma.hbm_to_vmem [thread:$0]  %s189_s1, 256, %s28_s17, [#allocation6], %s151_s12, %s151_s12, %s152_s13  }
  0x19   :  { %144 = dma.done.wait [#allocation3], 256  }
  0x1a   :  { %145 = vsyncadd [#allocation3], 4294967040 }
  0x1b   :  { %146 = dma.done.wait [#allocation6], 256  }
  0x1c   :  { %147 = vsyncadd [#allocation6], 4294967040  ;;  %v46_v0 = vld [vmem:[#allocation2] sm:$0xff]  ;;  %v48_v1 = vld [vmem:[#allocation5] sm:$0xff]  ;;  %s154_s0 = smov [#allocation7]  }
  0x1d   :  { %v47_v2 = vld [vmem:[#allocation2 + $0x8] sm:$0xff]  ;;  %v50_v3 = vsub.f32 %v46_v0, %v48_v1  ;;  %v49_v4 = vld [vmem:[#allocation5 + $0x8] sm:$0xff]  ;;  %s65_s21 = sshll.u32 %s154_s0, 4  ;;  %s66_s21 = int_to_ptr.vmem [resolvable:$true] %s65_s21 }
  0x1e   :  { %v51_v5 = vsub.f32 %v47_v2, %v49_v4  ;;  %s124_s22 = scalar_lea.vmem %s66_s21, 256  ;;  %p129_p11 = scmp.lt.s32.totalorder %s66_s21, %s66_s21 }
  0x1f   :  { %v52_v6 = vmul.f32 %v50_v3, %v50_v3  ;;  %p125_p10 = scmp.ne.s32.totalorder %s66_s21, %s124_s22  ;;  %p130_p12 = scmp.lt.s32.totalorder %s124_s22, %s124_s22 }
  0x20   :  { %v53_v7 = vmul.f32 %v51_v5, %v51_v5 }
  0x21   :  { %58 = vst [vmem:[#allocation7] sm:$0xff] %v52_v6  ;;  %p131_p13 = por %p130_p12, %p129_p11 }
  0x22   :  { %59 = vst [vmem:[#allocation7 + $0x8] sm:$0xff] %v53_v7 }
  0x23   :  { %p132_p0 = pnand %p131_p13, %p125_p10 }
  0x25   :  { %135 = shalt.err (!%p132_p0)
}
  0x26   :  { %71 = dma.vmem_to_hbm [thread:$0]  %s66_s21, 256, %s190_s2, [#allocation4], %s151_s12, %s151_s12, %s152_s13  }
  0x27   :  { %148 = dma.done.wait [#allocation4], 256  }
  0x28   :  { %149 = vsyncadd [#allocation4], 4294967040 }
  0x29   :  { %75 = vsyncpa [#allocation3], 1 }
  0x2a   :  { %76 = vsyncpa [#allocation6], 1 }
  0x2b   :  { %77 = vsyncpa [#allocation4], 1 }

</bundles_post_ra>
